<compile_context>
chip_gen: v7x
topology: tpu7x:2x2x1
jax: 0.10.0
libtpu: 0.0.40
codegen_flags: <defaults>
</compile_context>

<pallas_src>
import jax
import jax.numpy as jnp
from jax.experimental import pallas as pl
from jax.experimental.pallas import tpu as pltpu

SIM_COLS = (1, 2, 0, 3)   # order of x[:, [1, 2, 0, 3]]
BLINK_COL = 10
CTX_COL = 17


def _lnn_kernel(s_ref, x_ref, thr_ref, wor_ref, o_ref):
    """LNN forward on one lane-dense tile.

    s_ref:   SMEM f32[5]  -> [or_beta, and_w0, and_w1, and_w2, and_beta]
    x_ref:   VMEM (6, tile_n) feature rows: 0..3 sim (cols 1,2,0,3), 4 blink, 5 context
    thr_ref: VMEM (6, 1)  sigmoid(threshold) per row (row 4 unused -> 0)
    wor_ref: VMEM (6, 1)  OR weights on rows 0..3, zeros on rows 4..5
    o_ref:   VMEM (1, tile_n) output
    """
    x = x_ref[...]                                        # (6, tile_n)

    # One full-block sigmoid gating (broadcast (6,1) thresholds along lanes).
    g = x * jax.nn.sigmoid(x - thr_ref[...])              # (6, tile_n)

    # Weighted Lukasiewicz OR over the 4 sim rows: full-block mul + sublane reduce (XLU).
    acc = jnp.sum(g * wor_ref[...], axis=0, keepdims=True)       # (1, tile_n)
    disj = 1.0 - jnp.clip(s_ref[0] - acc, 0.0, 1.0)

    # Weighted Lukasiewicz AND over [blink (ungated), disj, ctx_].
    blink = x[4:5, :]
    ctx_ = g[5:6, :]
    and_sum = (s_ref[1] * (1.0 - blink)
               + s_ref[2] * (1.0 - disj)
               + s_ref[3] * (1.0 - ctx_))
    o_ref[...] = jnp.clip(s_ref[4] - and_sum, 0.0, 1.0)


def context_lnn_blink_long(x, params, *, tile_n=65536):
    """x: (N, F>=18) float32. params: dict of small parameter arrays. Returns (N, 1)."""
    N = x.shape[0]

    # Prune + transpose: only the 6 used columns, batch on the lane axis.
    # allow_input_fusion below lets XLA fuse this into the pallas_call operand.
    cols = jnp.array(SIM_COLS + (BLINK_COL, CTX_COL), dtype=jnp.int32)
    xt = x[:, cols].T.astype(jnp.float32)                 # (6, N)

    # Lane-aligned tile; cap so n_tiles >= 2 whenever N allows it (v7x has 2 TCs and
    # the "parallel" grid axis is the only thing sharding work across them).
    half = ((-(-N // 2)) + 127) // 128 * 128              # round_up(ceil(N/2), 128)
    tile_n = max(128, min(tile_n, half))
    n_tiles = -(-N // tile_n)

    # Grid-invariant per-row constants: threshold sigmoids and OR weights as (6,1) columns.
    thr = jnp.concatenate([
        jax.nn.sigmoid(params["threshold"].reshape(-1)),            # rows 0..3
        jnp.zeros((1,), jnp.float32),                               # row 4 (blink) unused
        jax.nn.sigmoid(params["context_threshold"].reshape(-1)),    # row 5
    ]).astype(jnp.float32).reshape(6, 1)

    w_or = jnp.concatenate([
        params["or_w"].reshape(-1),
        jnp.zeros((2,), jnp.float32),
    ]).astype(jnp.float32).reshape(6, 1)

    scal = jnp.concatenate([
        params["or_beta"].reshape(-1),
        params["and_w"].reshape(-1),
        params["and_beta"].reshape(-1),
    ]).astype(jnp.float32)                                # (5,) -> SMEM

    y = pl.pallas_call(
        _lnn_kernel,
        out_shape=jax.ShapeDtypeStruct((1, N), jnp.float32),
        grid=(n_tiles,),
        in_specs=[
            pl.BlockSpec(memory_space=pltpu.MemorySpace.SMEM),      # packed scalar params
            pl.BlockSpec((6, tile_n), lambda i: (0, i)),            # feature slab tile
            pl.BlockSpec((6, 1), lambda i: (0, 0)),                 # threshold column
            pl.BlockSpec((6, 1), lambda i: (0, 0)),                 # OR weight column
        ],
        out_specs=pl.BlockSpec((1, tile_n), lambda i: (0, i)),      # lane-dense output
        compiler_params=pltpu.CompilerParams(
            dimension_semantics=("parallel",),
            allow_input_fusion=[False, True, False, False],
            vmem_limit_bytes=32 * 1024 * 1024,
        ),
    )(scal, xt, thr, w_or)

    return y[0, :N].reshape(N, 1)


def init_params():
    """Deterministic parameter init matching the module's __init__ defaults."""
    return {
        "threshold": jnp.array([[0.2, 0.2, 0.2, 0.2]], dtype=jnp.float32),
        "context_threshold": jnp.array([[0.25]], dtype=jnp.float32),
        "or_w": jnp.ones((1, 4), dtype=jnp.float32),
        "or_beta": jnp.ones((1, 1), dtype=jnp.float32),
        "and_w": jnp.ones((1, 3), dtype=jnp.float32),
        "and_beta": jnp.ones((1, 1), dtype=jnp.float32),
    }


def reference_forward(x, p):
    """Pure-JAX reference mirroring the PyTorch forward."""
    blink = x[:, 10:11]
    ctx = x[:, 17:18]
    ctx_ = ctx * jax.nn.sigmoid(ctx - jax.nn.sigmoid(p["context_threshold"][0, 0]))
    sim = x[:, jnp.array(SIM_COLS)]
    sim_ = sim * jax.nn.sigmoid(sim - jax.nn.sigmoid(p["threshold"][0]))
    disj = 1.0 - jnp.clip(p["or_beta"][0, 0] - sim_ @ p["or_w"][0][:, None], 0.0, 1.0)
    cat = jnp.concatenate([blink, disj, ctx_], axis=1)
    yhat = jnp.clip(p["and_beta"][0, 0] - (1.0 - cat) @ p["and_w"][0][:, None], 0.0, 1.0)
    return yhat


if __name__ == "__main__":
    key = jax.random.PRNGKey(0)
    N, F = 1000, 18                     # forward indexes columns 10 and 17 -> F >= 18;
                                        # N not a multiple of 128 to exercise edge masking
    x = jax.random.uniform(key, (N, F), dtype=jnp.float32)   # scores in [0, 1]

    params = init_params()
    y = context_lnn_blink_long(x, params)
    y = jax.block_until_ready(y)

    y_ref = reference_forward(x, params)
    assert y.shape == (N, 1)
    assert jnp.allclose(y, y_ref, atol=1e-5, rtol=1e-5), "mismatch vs pure-JAX reference"
    print("KERNEL_OK")
</pallas_src>

<mosaic_0001>
module attributes {stable_mosaic.version = 11 : i64} {
  func.func @_lnn_kernel(%arg0: i32, %arg1: memref<5xf32, #tpu.memory_space<smem>>, %arg2: memref<6x512xf32, #tpu.memory_space<vmem>>, %arg3: memref<6x1xf32, #tpu.memory_space<vmem>>, %arg4: memref<6x1xf32, #tpu.memory_space<vmem>>, %arg5: memref<1x512xf32, #tpu.memory_space<vmem>>) attributes {dimension_semantics = [#tpu.dimension_semantics<parallel>], iteration_bounds = array<i64: 2>, scalar_prefetch = 0 : i64, scratch_operands = 0 : i64, tpu.core_type = #tpu.core_type<tc>, window_params = [{transform_indices = @transform_0, window_bounds = array<i64: 5>}, {transform_indices = @transform_1, window_bounds = array<i64: 6, 512>}, {pipeline_mode = #tpu.pipeline_mode<synchronous>, transform_indices = @transform_2, window_bounds = array<i64: 6, 1>}, {pipeline_mode = #tpu.pipeline_mode<synchronous>, transform_indices = @transform_3, window_bounds = array<i64: 6, 1>}, {transform_indices = @transform_4, window_bounds = array<i64: 1, 512>}]} {
    %c0 = arith.constant 0 : index
    %c0_0 = arith.constant 0 : index
    %0 = vector.load %arg2[%c0, %c0_0] : memref<6x512xf32, #tpu.memory_space<vmem>>, vector<6x512xf32>
    %c0_1 = arith.constant 0 : index
    %c0_2 = arith.constant 0 : index
    %1 = vector.load %arg3[%c0_1, %c0_2] : memref<6x1xf32, #tpu.memory_space<vmem>>, vector<6x1xf32>
    %2 = vector.broadcast %1 : vector<6x1xf32> to vector<6x512xf32>
    %3 = arith.subf %0, %2 : vector<6x512xf32>
    %4 = arith.negf %3 : vector<6x512xf32>
    %5 = math.exp %4 : vector<6x512xf32>
    %cst = arith.constant 1.000000e+00 : f32
    %6 = vector.broadcast %cst : f32 to vector<6x512xf32>
    %7 = arith.addf %6, %5 : vector<6x512xf32>
    %8 = arith.divf %6, %7 : vector<6x512xf32>
    %9 = arith.mulf %0, %8 : vector<6x512xf32>
    %c0_3 = arith.constant 0 : index
    %c0_4 = arith.constant 0 : index
    %10 = vector.load %arg4[%c0_3, %c0_4] : memref<6x1xf32, #tpu.memory_space<vmem>>, vector<6x1xf32>
    %11 = vector.broadcast %10 : vector<6x1xf32> to vector<6x512xf32>
    %12 = arith.mulf %9, %11 : vector<6x512xf32>
    %cst_5 = arith.constant dense<0.000000e+00> : vector<512xf32>
    %13 = vector.multi_reduction <add>, %12, %cst_5 [0] : vector<6x512xf32> to vector<512xf32>
    %14 = vector.shape_cast %13 : vector<512xf32> to vector<1x512xf32>
    %c0_6 = arith.constant 0 : index
    %15 = memref.load %arg1[%c0_6] : memref<5xf32, #tpu.memory_space<smem>>
    %16 = vector.broadcast %15 : f32 to vector<1x512xf32>
    %17 = arith.subf %16, %14 : vector<1x512xf32>
    %cst_7 = arith.constant 0.000000e+00 : f32
    %cst_8 = arith.constant 1.000000e+00 : f32
    %18 = vector.broadcast %cst_7 : f32 to vector<1x512xf32>
    %19 = arith.maximumf %18, %17 : vector<1x512xf32>
    %20 = vector.broadcast %cst_8 : f32 to vector<1x512xf32>
    %21 = arith.minimumf %20, %19 : vector<1x512xf32>
    %cst_9 = arith.constant 1.000000e+00 : f32
    %22 = vector.broadcast %cst_9 : f32 to vector<1x512xf32>
    %23 = arith.subf %22, %21 : vector<1x512xf32>
    %24 = vector.extract_strided_slice %0 {offsets = [4, 0], sizes = [1, 512], strides = [1, 1]} : vector<6x512xf32> to vector<1x512xf32>
    %25 = vector.extract_strided_slice %9 {offsets = [5, 0], sizes = [1, 512], strides = [1, 1]} : vector<6x512xf32> to vector<1x512xf32>
    %c1 = arith.constant 1 : index
    %26 = memref.load %arg1[%c1] : memref<5xf32, #tpu.memory_space<smem>>
    %cst_10 = arith.constant 1.000000e+00 : f32
    %27 = vector.broadcast %cst_10 : f32 to vector<1x512xf32>
    %28 = arith.subf %27, %24 : vector<1x512xf32>
    %29 = vector.broadcast %26 : f32 to vector<1x512xf32>
    %30 = arith.mulf %29, %28 : vector<1x512xf32>
    %c2 = arith.constant 2 : index
    %31 = memref.load %arg1[%c2] : memref<5xf32, #tpu.memory_space<smem>>
    %cst_11 = arith.constant 1.000000e+00 : f32
    %32 = vector.broadcast %cst_11 : f32 to vector<1x512xf32>
    %33 = arith.subf %32, %23 : vector<1x512xf32>
    %34 = vector.broadcast %31 : f32 to vector<1x512xf32>
    %35 = arith.mulf %34, %33 : vector<1x512xf32>
    %36 = arith.addf %30, %35 : vector<1x512xf32>
    %c3 = arith.constant 3 : index
    %37 = memref.load %arg1[%c3] : memref<5xf32, #tpu.memory_space<smem>>
    %cst_12 = arith.constant 1.000000e+00 : f32
    %38 = vector.broadcast %cst_12 : f32 to vector<1x512xf32>
    %39 = arith.subf %38, %25 : vector<1x512xf32>
    %40 = vector.broadcast %37 : f32 to vector<1x512xf32>
    %41 = arith.mulf %40, %39 : vector<1x512xf32>
    %42 = arith.addf %36, %41 : vector<1x512xf32>
    %c4 = arith.constant 4 : index
    %43 = memref.load %arg1[%c4] : memref<5xf32, #tpu.memory_space<smem>>
    %44 = vector.broadcast %43 : f32 to vector<1x512xf32>
    %45 = arith.subf %44, %42 : vector<1x512xf32>
    %cst_13 = arith.constant 0.000000e+00 : f32
    %cst_14 = arith.constant 1.000000e+00 : f32
    %46 = vector.broadcast %cst_13 : f32 to vector<1x512xf32>
    %47 = arith.maximumf %46, %45 : vector<1x512xf32>
    %48 = vector.broadcast %cst_14 : f32 to vector<1x512xf32>
    %49 = arith.minimumf %48, %47 : vector<1x512xf32>
    %c0_15 = arith.constant 0 : index
    %c0_16 = arith.constant 0 : index
    %50 = vector.load %arg5[%c0_15, %c0_16] : memref<1x512xf32, #tpu.memory_space<vmem>>, vector<1x512xf32>
    tpu.vector_store %arg5[%c0_15, %c0_16], %49 {strides = array<i32>} : memref<1x512xf32, #tpu.memory_space<vmem>>, vector<1x512xf32>,
    return
  }
  func.func @transform_0(%arg0: i32) -> i32 {
    %c0_i32 = arith.constant 0 : i32
    %c0_i32_0 = arith.constant 0 : i32
    return %c0_i32 : i32
  }
  func.func @transform_1(%arg0: i32) -> (i32, i32) {
    %c0_i32 = arith.constant 0 : i32
    %c0_i32_0 = arith.constant 0 : i32
    return %c0_i32, %arg0 : i32, i32
  }
  func.func @transform_2(%arg0: i32) -> (i32, i32) {
    %c0_i32 = arith.constant 0 : i32
    %c0_i32_0 = arith.constant 0 : i32
    %c0_i32_1 = arith.constant 0 : i32
    return %c0_i32, %c0_i32_0 : i32, i32
  }
  func.func @transform_3(%arg0: i32) -> (i32, i32) {
    %c0_i32 = arith.constant 0 : i32
    %c0_i32_0 = arith.constant 0 : i32
    %c0_i32_1 = arith.constant 0 : i32
    return %c0_i32, %c0_i32_0 : i32, i32
  }
  func.func @transform_4(%arg0: i32) -> (i32, i32) {
    %c0_i32 = arith.constant 0 : i32
    %c0_i32_0 = arith.constant 0 : i32
    return %c0_i32, %arg0 : i32, i32
  }
}

</mosaic_0001>

<bundles_post_ra>
// kernel: tpu_custom_call.1
= control target key start
LH: loop header
LB: loop body
LE: loop exit
PB: predicated region body
PF: predicated region fallthrough
CT: control target
= control target key end

     0   :  { %9 = vsyncpa [#allocation5], 0  ;;  %s1012_s0 = inlined_call_operand.vmem [shape: f32[5], index: 0, kind: input, shape index: {}]   ;;  %s1013_s1 = inlined_call_operand.hbm [shape: f32[6,1000], index: 1, kind: input, shape index: {}]   ;;  %s1014_s2 = inlined_call_operand.vmem [shape: f32[6,1], index: 2, kind: input, shape index: {}]   ;;  %s1015_s3 = inlined_call_operand.vmem [shape: f32[6,1], index: 3, kind: input, shape index: {}]   ;;  %s1016_s4 = inlined_call_operand.hbm [shape: f32[1,1000], index: 4, kind: output, shape index: {}]  }
   0x1   :  { %10 = vsyncpa [#allocation3], 0 }
   0x2   :  { %12 = vsyncpa [#allocation3 + $0x1], 0 }
   0x3   :  { %13 = vsyncpa [#allocation4], 0 }
   0x4   :  { %15 = vsyncpa [#allocation4 + $0x1], 0  ;;  %s773_s15 = smov 0   ;;  %s775_s16 = smov 0  }
   0x5   :  { %s777_s17 = smov 0   ;;  %s779_s18 = smov 0  }
   0x6 LB: > { %s794_s19 = sadd.s32 4294967295, %s741_s18   ;;  %s524_s20 = sadd.s32 4294967294, %s741_s18   ;;  %s741_s18 = sphi %s779_s18, %s1037_s18   ;;  %s737_s17 = sphi %s777_s17, %s1036_s17   ;;  %s733_s16 = sphi %s775_s16, %s1035_s16   ;;  %s729_s15 = sphi %s773_s15, %s1034_s15  }
   0x7   : > { %p62_p0 = scmp.ne.s32.totalorder %s733_s16, %s729_s15  ;;  %p1017_p1 = scmp.eq.s32.totalorder %s794_s19, 0 }
   0x8   : > { %p134_p3 = scmp.eq.s32.totalorder %s524_s20, 1  ;;  %p525_p5 = scmp.ge.s32.totalorder %s741_s18, 1 }
   0x9   : > { %p803_p4 = por %p1017_p1, %p62_p0  ;;  %p141_p7 = scmp.lt.s32.totalorder %s741_s18, 3 }
   0xa   : > { %p808_p6 = por %p134_p3, %p62_p0  ;;  %s154_s25 = sshll.u32 %s1012_s0, 4  ;;  %s155_s25 = int_to_ptr.vmem [resolvable:$true] %s154_s25 }
   0xb   : > { %s1020_s21 = scalar_select %p803_p4, 1, 0 }
   0xc   : > { %s1021_s22 = scalar_select %p808_p6, 1, 0 }
   0xd   : > { %p816_p8 = pnand %p525_p5, %p141_p7  ;;  %s824_s27 = sadd.s32 1, %s741_s18  }
   0xe   : > { %s46_s29 = ssub.s32 %s741_s18, %s824_s27  ;;  %s49_s5 = sadd.s32 1, %s737_s17 }
   0xf   : > { %p558_p10 = pneg %p816_p8  ;;  %p834_p12 = scmp.eq.s32.totalorder %s46_s29, 0 }
  0x10   : > { %p56_p13 = scmp.ne.s32.totalorder %s737_s17, %s733_s16  ;;  %s626_s6 = scalar_lea.vmem %s155_s25, 16 }
  0x11   : > { %p828_p11 = pnand %p558_p10, %p1017_p1  ;;  %p627_p0 = scmp.ne.s32.totalorder %s155_s25, %s626_s6 }
  0x12   : > { %p634_p9 = scmp.lt.s32.totalorder %s155_s25, %s155_s25  ;;  %p635_p2 = scmp.lt.s32.totalorder %s626_s6, %s626_s6 }
  0x13   : > { %p628_p3 = pneg %p828_p11 }
  0x14   : > { %p636_p10 = por %p635_p2, %p634_p9 }
  0x15   : > { %p629_p5 = pnand %p628_p3, %p627_p0 }
  0x17   : > { %p630_p7 = pneg %p629_p5 }
  0x19   : > { %p637_p1 = pnand %p636_p10, %p630_p7 }
  0x1b   : > { %640 = shalt.err (!%p637_p1)
}
  0x1c   : > { %s743_s7 = smov [#allocation2]   ;;  %p57_p2 = scmp.eq.s32.totalorder %s741_s18, 0 }
  0x1d   : > { %561 = dma.vmem_to_smem (!%p828_p11), %s155_s25, 16, %s743_s7, [#allocation5]  }
  0x1e   : > { %s848_s8 = scalar_select %p834_p12, %s737_s17, %s49_s5  }
  0x1f   : > { %p1025_p1 = scmp.eq.s32.totalorder %s794_s19, 1  ;;  %p571_p0 = scmp.lt.s32.totalorder %s741_s18, 2 }
  0x20   : > { %s171_s10 = sand.u32 1, %s737_s17   ;;  %p58_p3 = por %p57_p2, %p56_p13 }
  0x21   : > { %p856_p9 = por %p1025_p1, %p56_p13  ;;  %s528_s11 = sshll.u32 %s171_s10, 5 }
  0x22   : > { %s548_s12 = sshll.u32 %s741_s18, 9  ;;  %s175_s23 = scalar_lea.vmem [#allocation6], %s528_s11 }
  0x23   : > { %s1026_s9 = scalar_select %p856_p9, 1, 0 }
  0x24   : > { %s869_s20 = scalar_lea.hbm %s1013_s1, %s548_s12  ;;  %s183_s24 = sshll.u32 %s175_s23, 4  ;;  %s875_s24 = int_to_ptr.vmem [resolvable:$true] %s183_s24 }
  0x25   : > { %p871_p11 = pnand %p571_p0, %p58_p3  ;;  %s172_s28 = scalar_lea.sflag [#allocation3], %s171_s10 }
  0x26   : > { %s641_s29 = scalar_lea.hbm %s869_s20, 512  ;;  %s646_s6 = scalar_lea.hbm %s1013_s1, 1024 }
  0x27   : > { %p642_p12 = scmp.ne.s32.totalorder %s869_s20, %s641_s29  ;;  %p643_p13 = pneg %p871_p11 }
  0x28   : > { %p647_p10 = scmp.lt.u32.totalorder %s869_s20, %s1013_s1  ;;  %p648_p2 = scmp.lt.u32.totalorder %s646_s6, %s641_s29 }
  0x29   : > { %p644_p5 = pnand %p643_p13, %p642_p12  ;;  %p650_p0 = scmp.lt.u32.totalorder %s641_s29, %s869_s20 }
  0x2a   : > { %p649_p1 = por %p648_p2, %p647_p10 }
  0x2b   : > { %p645_p7 = pneg %p644_p5 }
  0x2c   : > { %p651_p3 = por %p650_p0, %p649_p1 }
  0x2e   : > { %p652_p6 = pnand %p651_p3, %p645_p7 }
  0x30   : > { %655 = shalt.err (!%p652_p6)
}
  0x31   : > { %s656_s10 = scalar_lea.vmem %s875_s24, 512  ;;  %s744_s12 = smov [#allocation6]  }
  0x32   : > { %p657_p12 = scmp.ne.s32.totalorder %s875_s24, %s656_s10  ;;  %s661_s13 = sshll.u32 %s744_s12, 4  ;;  %s662_s13 = int_to_ptr.vmem [resolvable:$false] %s661_s13 }
  0x33   : > { %s663_s14 = scalar_lea.vmem %s662_s13, 1024  ;;  %p664_p4 = scmp.lt.s32.totalorder %s875_s24, %s662_s13 }
  0x34   : > { %p659_p5 = pnand %p657_p12, %p643_p13  ;;  %p665_p10 = scmp.lt.s32.totalorder %s663_s14, %s656_s10 }
  0x36   : > { %p660_p9 = pneg %p659_p5  ;;  %p666_p2 = por %p665_p10, %p664_p4 }
  0x38   : > { %p667_p1 = pnand %p666_p2, %p660_p9 }
  0x3a   : > { %670 = shalt.err (!%p667_p1)
}
  0x3b   : > { %565 = dma.hbm_to_vmem [thread:$0]  (!%p871_p11), %s869_s20, 512, %s875_s24, %s172_s28  }
  0x3c   : > { %192 = sbr.rel (%p816_p8) target bundleno = 296 (0x128), region = 36  ;;  %p1028_p6 = scmp.eq.s32.totalorder (!%p816_p8), %s794_s19, 0 }
  0x43   : > { %716 = dma.done.wait (%p1028_p6), [#allocation5], 16   ;;  %p1029_p13 = pmov %p1028_p6 }
  0x44   : > { %s909_s23 = sand.u32 1, %s733_s16   ;;  %p1030_p4 = scmp.ne.s32.totalorder %s1020_s21, 0 }
  0x45   : > { %718 = vsyncadd (%p1029_p13), [#allocation5], 4294967280  ;;  %s533_s29 = sshll.u32 %s909_s23, 5  ;;  %s199_s25 = scalar_lea.sflag [#allocation3], %s909_s23 }
  0x46   : > { %s202_s30 = scalar_lea.vmem [#allocation6], %s533_s29 }
  0x47   : > { %720 = dma.done.wait (%p1030_p4), %s199_s25, 512  }
  0x48   : > { %722 = vsyncadd (%p1030_p4), %s199_s25, 4294966784 }
  0x49   : > { %207 = sfence }
  0x4a   : > { %v234_v0 = vld [vmem:[%s1014_s2] sm:$0x3f]  ;;  %v745_v1 = vmov 0   ;;  %v925_v4 = vld [vmem:[%s202_s30 + $0x8] sm:$0x3f]  ;;  %vm282_vm0 = vcmask 1045504  }
  0x4b   : > { %609 = vset.pattern.permute.xlu0 %v745_v1  ;;  %v272_v2 = vld [vmem:[%s1015_s3] sm:$0x3f]  ;;  %v927_v5 = vld [vmem:[%s202_s30 + $0x10] sm:$0x3f]  ;;  %v929_v6 = vld [vmem:[%s202_s30 + $0x18] sm:$0x3f] }
  0x4c   : > { %237 = vperm.xlu0 %609, %v234_v0   ;;  %v923_v3 = vld [vmem:[%s202_s30] sm:$0x3f]  ;;  %s311_s21 = sld [smem:[#allocation2]]  ;;  %s539_s5 = sld [smem:[#allocation2 + $0x1]] }
  0x4d   : > { %s541_s6 = sld [smem:[#allocation2 + $0x3]]  ;;  %s540_s7 = sld [smem:[#allocation2 + $0x2]]  ;;  %v330_v0 = vsub.f32 1.0, %v923_v3 }
  0x4e   : > { %s542_s11 = sld [smem:[#allocation2 + $0x4]]  ;;  %s534_s10 = sshll.u32 %s909_s23, 2 }
  0x4f   : > { %s549_s12 = sshll.u32 %s794_s19, 6  ;;  %s227_s13 = scalar_lea.vmem [#allocation7], %s534_s10 }
  0x50   : > { %275 = vperm.xlu0 %609, %v272_v2   ;;  %s442_s14 = sshll.u32 %s227_s13, 4  ;;  %s968_s30 = scalar_lea.hbm %s1016_s4, %s549_s12  ;;  %s970_s14 = int_to_ptr.vmem [resolvable:$true] %s442_s14 }
  0x51   : > { %s428_s26 = scalar_lea.sflag [#allocation4], %s909_s23  ;;  %s671_s20 = scalar_lea.vmem %s970_s14, 64 }
  0x52   : > { %v312_v57 = vstv %s311_s21  ;;  %p672_p8 = scmp.ne.s32.totalorder %s970_s14, %s671_s20  ;;  %p1031_p9 = scmp.ne.s32.totalorder %s1026_s9, 0 }
  0x53   : > { %s747_s19 = smov [#allocation7]  }
  0x54   : > { %p673_p11 = pnand %p672_p8, %p1031_p9  ;;  %s675_s24 = sshll.u32 %s747_s19, 4  ;;  %s676_s24 = int_to_ptr.vmem [resolvable:$false] %s675_s24 }
  0x55   : > { %s677_s28 = scalar_lea.vmem %s676_s24, 128  ;;  %p678_p0 = scmp.lt.s32.totalorder %s970_s14, %s676_s24 }
  0x56   : > { %p674_p7 = pneg %p673_p11  ;;  %p679_p3 = scmp.lt.s32.totalorder %s677_s28, %s671_s20 }
  0x58   : > { %p680_p12 = por %p679_p3, %p678_p0 }
  0x5a   : > { %p681_p5 = pnand %p680_p12, %p674_p7 }
  0xcb   : > { %v238_v7 = vpop.permute.xlu0 %237 }
  0xcc   : > { %v240_v8 = vsub.f32 %v923_v3, %v238_v7  ;;  %v241_v9 = vsub.f32 %v925_v4, %v238_v7  ;;  %v242_v10 = vsub.f32 %v927_v5, %v238_v7  ;;  %v243_v11 = vsub.f32 %v929_v6, %v238_v7 }
  0xcd   : > { %v334_v7 = vstv %s539_s5 }
  0xce   : > { %v535_v12 = vmul.f32 -1.442695, %v240_v8  ;;  %v536_v13 = vmul.f32 -1.442695, %v241_v9  ;;  %v537_v14 = vmul.f32 -1.442695, %v242_v10 }
  0xcf   : > { %v538_v15 = vmul.f32 -1.442695, %v243_v11  ;;  %v276_v28 = vpop.permute.xlu0 %275  ;;  %v331_v10 = vsub.f32 1.0, %v925_v4 }
  0xd0   : > { %610 = vpow2.f32 %v535_v12 }
  0xd1   : > { %612 = vpow2.f32 %v536_v13  ;;  %v332_v13 = vsub.f32 1.0, %v927_v5 }
  0xd2   : > { %614 = vpow2.f32 %v537_v14  ;;  %v333_v14 = vsub.f32 1.0, %v929_v6 }
  0xd3   : > { %616 = vpow2.f32 %v538_v15 }
  0xda   : > { %v611_v16 = vpop.eup %610 }
  0xdb   : > { %v613_v17 = vpop.eup %612  ;;  %v256_v18 = vadd.f32 1.0, %v611_v16 }
  0xdc   : > { %v615_v19 = vpop.eup %614  ;;  %v257_v20 = vadd.f32 1.0, %v613_v17  ;;  %v335_v17 = vmul.f32 %v334_v7, %v330_v0 }
  0xdd   : > { %v617_v21 = vpop.eup %616  ;;  %v258_v22 = vadd.f32 1.0, %v615_v19  ;;  %618 = vrcp.f32 %v256_v18 }
  0xde   : > { %v259_v23 = vadd.f32 1.0, %v617_v21  ;;  %620 = vrcp.f32 %v257_v20  ;;  %v358_v20 = vstv %s541_s6 }
  0xdf   : > { %622 = vrcp.f32 %v258_v22 }
  0xe0   : > { %624 = vrcp.f32 %v259_v23 }
  0xe7   : > { %v619_v24 = vpop.eup %618 }
  0xe8   : > { %v621_v25 = vpop.eup %620  ;;  %v936_v26 = vmul.f32 %v619_v24, %v923_v3 }
  0xe9   : > { %v623_v27 = vpop.eup %622  ;;  %v939_v29 = vmul.f32 %v621_v25, %v925_v4  ;;  %v336_v4 = vmul.f32 %v334_v7, %v331_v10 }
  0xea   : > { %v625_v30 = vpop.eup %624  ;;  %v942_v31 = vmul.f32 %v623_v27, %v927_v5  ;;  %v278_v32 = vmul.f32 %v276_v28, %v936_v26  ;;  %v354_v3 = vsub.f32 1.0, %v936_v26  ;;  %v344_v27 = vstv %s540_s7 }
  0xeb   : > { %v946_v33 = vmul.f32 %v625_v30, %v929_v6  ;;  %v279_v34 = vmul.f32 %v276_v28, %v939_v29  ;;  %v355_v23 = vsub.f32 1.0, %v939_v29 }
  0xec   : > { %v280_v35 = vmul.f32 %v276_v28, %v942_v31  ;;  %v283_v36 = vsel %vm282_vm0, %v278_v32, 0.0  ;;  %v356_v5 = vsub.f32 1.0, %v942_v31  ;;  %v337_v32 = vmul.f32 %v334_v7, %v332_v13 }
  0xed   : > { %v281_v37 = vmul.f32 %v276_v28, %v946_v33  ;;  %v284_v38 = vrot.slane %v283_v36, 4  ;;  %v290_v39 = vsel %vm282_vm0, %v279_v34, 0.0  ;;  %v357_v30 = vsub.f32 1.0, %v946_v33 }
  0xee   : > { %v291_v40 = vrot.slane %v290_v39, 4  ;;  %v297_v41 = vsel %vm282_vm0, %v280_v35, 0.0 }
  0xef   : > { %v285_v42 = vadd.f32 %v284_v38, %v283_v36  ;;  %v298_v43 = vrot.slane %v297_v41, 4  ;;  %v304_v44 = vsel %vm282_vm0, %v281_v37, 0.0  ;;  %v359_v36 = vmul.f32 %v358_v20, %v354_v3 }
  0xf0   : > { %v292_v45 = vadd.f32 %v291_v40, %v290_v39  ;;  %v305_v46 = vrot.slane %v304_v44, 4  ;;  %v360_v38 = vmul.f32 %v358_v20, %v355_v23  ;;  %v338_v39 = vmul.f32 %v334_v7, %v333_v14 }
  0xf1   : > { %v286_v47 = vrot.slane %v285_v42, 2  ;;  %v299_v48 = vadd.f32 %v298_v43, %v297_v41  ;;  %v361_v41 = vmul.f32 %v358_v20, %v356_v5  ;;  %v362_v31 = vmul.f32 %v358_v20, %v357_v30 }
  0xf2   : > { %v293_v49 = vrot.slane %v292_v45, 2  ;;  %v306_v50 = vadd.f32 %v305_v46, %v304_v44 }
  0xf3   : > { %v287_v51 = vadd.f32 %v286_v47, %v285_v42  ;;  %v300_v52 = vrot.slane %v299_v48, 2  ;;  %v380_v42 = vstv %s542_s11  ;;  %v367_v47 = vrot.slane %v359_v36, 1 }
  0xf4   : > { %v294_v53 = vadd.f32 %v293_v49, %v292_v45  ;;  %v307_v54 = vrot.slane %v306_v50, 2 }
  0xf5   : > { %v288_v55 = vrot.slane %v287_v51, 1  ;;  %v301_v56 = vadd.f32 %v300_v52, %v299_v48  ;;  %v746_v48 = vmov 1966171168   ;;  %v402_v52 = vlaneseq }
  0xf6   : > { %v295_v58 = vrot.slane %v294_v53, 1  ;;  %v308_v59 = vadd.f32 %v307_v54, %v306_v50  ;;  %v400_v33 = vunpack.c.l.s4 %v746_v48  ;;  %v369_v54 = vrot.slane %v361_v41, 1 }
  0xf7   : > { %v289_v60 = vadd.f32 %v288_v55, %v287_v51  ;;  %v302_v61 = vrot.slane %v301_v56, 1  ;;  %v368_v51 = vrot.slane %v360_v38, 1  ;;  %v403_v0 = vshrl.u32 %v402_v52, 7 }
  0xf8   : > { %v296_v62 = vadd.f32 %v295_v58, %v294_v53  ;;  %v309_v63 = vrot.slane %v308_v59, 1  ;;  %vm424_vm1 = vcmp.lt.s32.totalorder %v402_v52, 512 }
  0xf9   : > { %v303_v1 = vadd.f32 %v302_v61, %v301_v56  ;;  %v313_v2 = vsub.f32 %v312_v57, %v289_v60 }
  0xfa   : > { %v310_v8 = vadd.f32 %v309_v63, %v308_v59  ;;  %v314_v9 = vsub.f32 %v312_v57, %v296_v62  ;;  %v401_v63 = vunpack.c.0.s8 %v400_v33 }
  0xfb   : > { %v315_v11 = vsub.f32 %v312_v57, %v303_v1  ;;  %v317_v12 = vmax.f32 %v313_v2, 0.0 }
  0xfc   : > { %v316_v15 = vsub.f32 %v312_v57, %v310_v8  ;;  %v318_v16 = vmax.f32 %v314_v9, 0.0  ;;  %v370_v57 = vrot.slane %v362_v31, 1  ;;  %v404_v13 = vsub.s32 %v401_v63, %v403_v0 }
  0xfd   : > { %v319_v18 = vmax.f32 %v315_v11, 0.0  ;;  %v321_v19 = vmin.f32 %v317_v12, 1.0 }
  0xfe   : > { %v320_v21 = vmax.f32 %v316_v15, 0.0  ;;  %v322_v22 = vmin.f32 %v318_v16, 1.0 }
  0xff   : > { %v323_v24 = vmin.f32 %v319_v18, 1.0  ;;  %v325_v25 = vsub.f32 1.0, %v321_v19 }
 0x100   : > { %v324_v6 = vmin.f32 %v320_v21, 1.0  ;;  %v326_v28 = vsub.f32 1.0, %v322_v22 }
 0x101   : > { %v327_v34 = vsub.f32 1.0, %v323_v24  ;;  %v340_v35 = vsub.f32 1.0, %v325_v25 }
 0x102   : > { %v328_v26 = vsub.f32 1.0, %v324_v6  ;;  %v341_v37 = vsub.f32 1.0, %v326_v28 }
 0x103   : > { %v342_v40 = vsub.f32 1.0, %v327_v34  ;;  %v345_v29 = vmul.f32 %v344_v27, %v340_v35 }
 0x104   : > { %v343_v43 = vsub.f32 1.0, %v328_v26  ;;  %v346_v44 = vmul.f32 %v344_v27, %v341_v37 }
 0x105   : > { %v347_v45 = vmul.f32 %v344_v27, %v342_v40  ;;  %v349_v46 = vadd.f32 %v345_v29, %v335_v17 }
 0x106   : > { %v348_v49 = vmul.f32 %v344_v27, %v343_v43  ;;  %v350_v50 = vadd.f32 %v346_v44, %v336_v4 }
 0x107   : > { %v351_v53 = vadd.f32 %v347_v45, %v337_v32  ;;  %v375_v55 = vadd.f32 %v367_v47, %v349_v46 }
 0x108   : > { %v352_v56 = vadd.f32 %v348_v49, %v338_v39  ;;  %v376_v58 = vadd.f32 %v368_v51, %v350_v50 }
 0x109   : > { %v377_v59 = vadd.f32 %v369_v54, %v351_v53  ;;  %v381_v60 = vsub.f32 %v380_v42, %v375_v55 }
 0x10a   : > { %v378_v61 = vadd.f32 %v370_v57, %v352_v56  ;;  %v382_v62 = vsub.f32 %v380_v42, %v376_v58 }
 0x10b   : > { %v383_v1 = vsub.f32 %v380_v42, %v377_v59  ;;  %v385_v2 = vmax.f32 %v381_v60, 0.0 }
 0x10c   : > { %v384_v7 = vsub.f32 %v380_v42, %v378_v61  ;;  %v386_v8 = vmax.f32 %v382_v62, 0.0 }
 0x10d   : > { %v387_v9 = vmax.f32 %v383_v1, 0.0  ;;  %v389_v10 = vmin.f32 %v385_v2, 1.0 }
 0x10e   : > { %v388_v11 = vmax.f32 %v384_v7, 0.0  ;;  %v390_v12 = vmin.f32 %v386_v8, 1.0 }
 0x10f   : > { %v391_v14 = vmin.f32 %v387_v9, 1.0 }
 0x110   : > { %v392_v15 = vmin.f32 %v388_v11, 1.0  ;;  %v397_v16 = vcombine.high %v389_v10, %v390_v12 }
 0x112   : > { %v398_v17 = vcombine.high %v391_v14, %v392_v15  ;;  %v405_v18 = vrot.slane %v397_v16, %v404_v13 }
 0x114   : > { %v412_v19 = vrot.slane %v398_v17, %v404_v13 }
 0x116   : > { %v413_v3 = vcombine.low %v405_v18, %v412_v19 }
 0x118   : > { %v420_v20 = vrot.slane %v413_v3, %v404_v13 }
 0x11a   : > { %426 = vst.msk [vmem:[%s227_s13] sm:$0xf] %vm424_vm1, %v420_v20 }
 0x11b   : > { %684 = shalt.err (!%p681_p5)
}
 0x11c   : > { %s685_s23 = scalar_lea.hbm %s968_s30, 64  ;;  %s689_s6 = scalar_lea.hbm %s1016_s4, 128 }
 0x11d   : > { %p686_p10 = scmp.ne.s32.totalorder %s968_s30, %s685_s23  ;;  %p690_p6 = scmp.lt.u32.totalorder %s968_s30, %s1016_s4 }
 0x11e   : > { %p691_p13 = scmp.lt.u32.totalorder %s689_s6, %s685_s23  ;;  %p693_p8 = scmp.lt.u32.totalorder %s685_s23, %s968_s30 }
 0x11f   : > { %p687_p2 = pnand %p686_p10, %p1031_p9 }
 0x120   : > { %p692_p4 = por %p691_p13, %p690_p6 }
 0x121   : > { %p688_p1 = pneg %p687_p2 }
 0x122   : > { %p694_p11 = por %p693_p8, %p692_p4 }
 0x124   : > { %p695_p7 = pnand %p694_p11, %p688_p1 }
 0x126   : > { %698 = shalt.err (!%p695_p7)
}
 0x127   : > { %556 = dma.vmem_to_hbm [thread:$0]  (%p1031_p9), %s970_s14, 64, %s968_s30, %s428_s26  }
 0x128 PF: > { %s454_s10 = sand.u32 1, %s729_s15   ;;  %p1032_p0 = scmp.ne.s32.totalorder %s1021_s22, 0 }
 0x129   : > { %p1033_p3 = scmp.ge.s32.totalorder %s741_s18, 2  ;;  %s455_s12 = scalar_lea.sflag [#allocation4], %s454_s10 }
 0x12b   : > { %p567_p12 = pnand %p1033_p3, %p1032_p0 }
 0x12d   : > { %724 = dma.done.wait (!%p567_p12), %s455_s12, 64  }
 0x12e   : > { %726 = vsyncadd (!%p567_p12), %s455_s12, 4294967232  ;;  %p18_p5 = scmp.ge.s32.totalorder %s824_s27, 4   ;;  %s1034_s15 = smov %s733_s16 }
 0x12f   : > { %s1035_s16 = smov %s737_s17  ;;  %s1036_s17 = smov %s848_s8 }
 0x130   : > { %s1037_s18 = smov %s824_s27  ;;  %20 = sbr.rel (!%p18_p5) target bundleno = 6 (0x6), region = 86 }
 0x137   :  { %460 = vsyncpa [#allocation3], 1 }
 0x138   :  { %462 = vsyncpa [#allocation3 + $0x1], 1 }
 0x139   :  { %463 = vsyncpa [#allocation4], 1 }
 0x13a   :  { %465 = vsyncpa [#allocation4 + $0x1], 1 }
 0x13b   :  { %466 = vsyncpa [#allocation5], 1 }
 0x13c   :  { %468 = vsyncpa [#allocation5 + $0x1], 1 }

</bundles_post_ra>
